<compile_context>
chip_gen: v5e
topology: v5e:2x2
jax: 0.10.0
libtpu: 0.0.40
codegen_flags: <defaults>
</compile_context>

<pallas_src>
import numpy as np
import jax
import jax.numpy as jnp
from jax import lax
from jax.experimental import pallas as pl
from jax.experimental.pallas import tpu as pltpu

GAMMA = 2.0          # focal exponent (hard-coded as (1-p)^2 below)
PROB_MIN = 0.0001    # clamp(min=0.0001); upper clamp (1.0) is a no-op for softmax


def cb_loss_kernel(w_ref, logits_ref, labels_ref, out_ref):
    # Resident scalar accumulator: zero it on the first grid step.
    @pl.when(pl.program_id(0) == 0)
    def _init():
        out_ref[...] = jnp.zeros_like(out_ref)

    logits = logits_ref[...]                                 # [C, TILE_N] f32
    c, tn = logits.shape

    # Numerically stable softmax over the class (sublane) axis.
    m = jnp.max(logits, axis=0, keepdims=True)               # [1, TILE_N]
    e = jnp.exp(logits - m)                                  # [C, TILE_N]
    denom = jnp.sum(e, axis=0, keepdims=True)                # [1, TILE_N]
    prob = e / denom                                         # [C, TILE_N]

    # One-hot compare (scatter_ equivalent); padded lanes carry label == -1,
    # so their one-hot row is all zeros and they contribute exactly 0.
    class_iota = lax.broadcasted_iota(jnp.int32, (c, tn), 0)
    one_hot = (class_iota == labels_ref[...]).astype(jnp.float32)   # [C, TILE_N]

    # Gather the true-class probability and class-balanced weight per row.
    p_true = jnp.sum(prob * one_hot, axis=0, keepdims=True)         # [1, TILE_N]
    w_true = jnp.sum(w_ref[...] * one_hot, axis=0, keepdims=True)   # [1, TILE_N]

    # Focal loss on the N selected values only (log on N, not N*C, elements).
    p = jnp.maximum(p_true, PROB_MIN)
    one_minus_p = 1.0 - p
    tile_loss = jnp.sum(-w_true * one_minus_p * one_minus_p * jnp.log(p),
                        keepdims=True)                               # [1, 1]

    out_ref[...] += tile_loss


def make_cb_weights(samples_per_cls, no_of_classes, beta):
    """Class-balanced weights, identical math to the PyTorch __init__."""
    effective_num = 1.0 - np.power(beta, np.asarray(samples_per_cls, dtype=np.float64))
    weights = (1.0 - beta) / effective_num
    weights = weights / np.sum(weights) * no_of_classes
    return jnp.asarray(weights, dtype=jnp.float32)           # [C]


def _round_up(x, m):
    return ((x + m - 1) // m) * m


def cb_loss(logits, labels, samples_per_cls, no_of_classes, beta, tile_n=2048):
    """logits: [N, C] float32, labels: [N] int (class indices). Returns scalar loss."""
    n, c = logits.shape
    assert c == no_of_classes

    w = make_cb_weights(samples_per_cls, no_of_classes, beta)        # [C]

    # Batch on the lane axis; pad batch to a multiple of the lane tile.
    tile_n = min(tile_n, _round_up(max(n, 1), 128))
    n_pad = _round_up(n, tile_n)
    num_tiles = n_pad // tile_n

    logits_t = jnp.zeros((c, n_pad), jnp.float32)
    logits_t = logits_t.at[:, :n].set(logits.astype(jnp.float32).T)  # [C, N_pad]
    labels_row = jnp.full((1, n_pad), -1, jnp.int32)
    labels_row = labels_row.at[0, :n].set(labels.astype(jnp.int32))  # [1, N_pad]
    w_col = w.reshape(c, 1)                                          # [C, 1]

    out = pl.pallas_call(
        cb_loss_kernel,
        out_shape=jax.ShapeDtypeStruct((1, 1), jnp.float32),
        grid=(num_tiles,),
        in_specs=[
            pl.BlockSpec((c, 1), lambda i: (0, 0)),        # class weights (tiny, reused)
            pl.BlockSpec((c, tile_n), lambda i: (0, i)),   # logits tile, lane-dense
            pl.BlockSpec((1, tile_n), lambda i: (0, i)),   # labels tile, lane-dense
        ],
        out_specs=pl.BlockSpec((1, 1), lambda i: (0, 0)),  # resident scalar accumulator
        compiler_params=pltpu.CompilerParams(
            dimension_semantics=("arbitrary",)),
    )(w_col, logits_t, labels_row)
    return out[0, 0]


if __name__ == "__main__":
    key = jax.random.PRNGKey(0)
    N = 16
    C = 7                       # FocalLoss hard-codes class_num=7 in CB_loss.forward
    beta = 0.9999
    samples_per_cls = [30, 20, 10, 50, 5, 15, 25]

    k_logits, k_labels = jax.random.split(key)
    logits = jax.random.normal(k_logits, (N, C), dtype=jnp.float32)
    labels = jax.random.randint(k_labels, (N,), 0, C, dtype=jnp.int32)

    loss = cb_loss(logits, labels, samples_per_cls, C, beta)
    jax.block_until_ready(loss)

    # sanity check against a plain-JAX reference of the same math
    w = make_cb_weights(samples_per_cls, C, beta)
    prob = jax.nn.softmax(logits, axis=1)
    prob = jnp.clip(prob, PROB_MIN, 1.0)
    one_hot = jax.nn.one_hot(labels, C, dtype=jnp.float32)
    ref = jnp.sum(-w[None, :] * (1.0 - prob) ** 2 * jnp.log(prob) * one_hot)
    assert jnp.allclose(loss, ref, rtol=1e-5, atol=1e-5), (loss, ref)

    print("KERNEL_OK")
</pallas_src>

<mosaic_0001>
module attributes {stable_mosaic.version = 11 : i64} {
  func.func @cb_loss_kernel(%arg0: i32, %arg1: memref<7x1xf32, #tpu.memory_space<vmem>>, %arg2: memref<7x128xf32, #tpu.memory_space<vmem>>, %arg3: memref<1x128xi32, #tpu.memory_space<vmem>>, %arg4: memref<1x1xf32, #tpu.memory_space<vmem>>) attributes {dimension_semantics = [#tpu.dimension_semantics<arbitrary>], iteration_bounds = array<i64: 1>, scalar_prefetch = 0 : i64, scratch_operands = 0 : i64, tpu.core_type = #tpu.core_type<tc>, window_params = [{pipeline_mode = #tpu.pipeline_mode<synchronous>, transform_indices = @transform_0, window_bounds = array<i64: 7, 1>}, {transform_indices = @transform_1, window_bounds = array<i64: 7, 128>}, {transform_indices = @transform_2, window_bounds = array<i64: 1, 128>}, {pipeline_mode = #tpu.pipeline_mode<synchronous>, transform_indices = @transform_3, window_bounds = array<i64: 1, 1>}]} {
    %c0_i32 = arith.constant 0 : i32
    %0 = arith.cmpi eq, %arg0, %c0_i32 : i32
    %1 = arith.extui %0 : i1 to i32
    %c0_i32_0 = arith.constant 0 : i32
    %2 = arith.cmpi ne, %1, %c0_i32_0 : i32
    scf.if %2 {
      %cst_17 = arith.constant 0.000000e+00 : f32
      %45 = vector.broadcast %cst_17 : f32 to vector<1x1xf32>
      %c0_18 = arith.constant 0 : index
      %c0_19 = arith.constant 0 : index
      %46 = vector.load %arg4[%c0_18, %c0_19] : memref<1x1xf32, #tpu.memory_space<vmem>>, vector<1x1xf32>
      tpu.vector_store %arg4[%c0_18, %c0_19], %45 {strides = array<i32>} : memref<1x1xf32, #tpu.memory_space<vmem>>, vector<1x1xf32>,
    } else {
    }
    %c0 = arith.constant 0 : index
    %c0_1 = arith.constant 0 : index
    %3 = vector.load %arg2[%c0, %c0_1] : memref<7x128xf32, #tpu.memory_space<vmem>>, vector<7x128xf32>
    %cst = arith.constant dense<0xFF800000> : vector<128xf32>
    %4 = vector.multi_reduction <maximumf>, %3, %cst [0] : vector<7x128xf32> to vector<128xf32>
    %5 = vector.shape_cast %4 : vector<128xf32> to vector<1x128xf32>
    %6 = vector.broadcast %5 : vector<1x128xf32> to vector<7x128xf32>
    %7 = arith.subf %3, %6 : vector<7x128xf32>
    %8 = math.exp %7 : vector<7x128xf32>
    %cst_2 = arith.constant dense<0.000000e+00> : vector<128xf32>
    %9 = vector.multi_reduction <add>, %8, %cst_2 [0] : vector<7x128xf32> to vector<128xf32>
    %10 = vector.shape_cast %9 : vector<128xf32> to vector<1x128xf32>
    %11 = vector.broadcast %10 : vector<1x128xf32> to vector<7x128xf32>
    %12 = arith.divf %8, %11 : vector<7x128xf32>
    %13 = tpu.iota {dimensions = array<i32: 0>} : vector<7x128xi32>
    %c0_3 = arith.constant 0 : index
    %c0_4 = arith.constant 0 : index
    %14 = vector.load %arg3[%c0_3, %c0_4] : memref<1x128xi32, #tpu.memory_space<vmem>>, vector<1x128xi32>
    %15 = vector.broadcast %14 : vector<1x128xi32> to vector<7x128xi32>
    %16 = arith.cmpi eq, %13, %15 : vector<7x128xi32>
    %17 = arith.extui %16 : vector<7x128xi1> to vector<7x128xi32>
    %18 = arith.sitofp %17 : vector<7x128xi32> to vector<7x128xf32>
    %19 = arith.mulf %12, %18 : vector<7x128xf32>
    %cst_5 = arith.constant dense<0.000000e+00> : vector<128xf32>
    %20 = vector.multi_reduction <add>, %19, %cst_5 [0] : vector<7x128xf32> to vector<128xf32>
    %21 = vector.shape_cast %20 : vector<128xf32> to vector<1x128xf32>
    %c0_6 = arith.constant 0 : index
    %c0_7 = arith.constant 0 : index
    %22 = vector.load %arg1[%c0_6, %c0_7] : memref<7x1xf32, #tpu.memory_space<vmem>>, vector<7x1xf32>
    %23 = vector.broadcast %22 : vector<7x1xf32> to vector<7x128xf32>
    %24 = arith.mulf %23, %18 : vector<7x128xf32>
    %cst_8 = arith.constant dense<0.000000e+00> : vector<128xf32>
    %25 = vector.multi_reduction <add>, %24, %cst_8 [0] : vector<7x128xf32> to vector<128xf32>
    %26 = vector.shape_cast %25 : vector<128xf32> to vector<1x128xf32>
    %cst_9 = arith.constant 9.99999974E-5 : f32
    %27 = vector.broadcast %cst_9 : f32 to vector<1x128xf32>
    %28 = arith.maximumf %21, %27 : vector<1x128xf32>
    %cst_10 = arith.constant 1.000000e+00 : f32
    %29 = vector.broadcast %cst_10 : f32 to vector<1x128xf32>
    %30 = arith.subf %29, %28 : vector<1x128xf32>
    %cst_11 = arith.constant 0.000000e+00 : f32
    %31 = vector.broadcast %cst_11 : f32 to vector<1x128xf32>
    %32 = arith.subf %31, %26 : vector<1x128xf32>
    %33 = arith.mulf %32, %30 : vector<1x128xf32>
    %34 = arith.mulf %33, %30 : vector<1x128xf32>
    %35 = math.log %28 : vector<1x128xf32>
    %36 = arith.mulf %34, %35 : vector<1x128xf32>
    %37 = vector.shape_cast %36 : vector<1x128xf32> to vector<1x1x128xf32>
    %cst_12 = arith.constant dense<0.000000e+00> : vector<1xf32>
    %38 = vector.multi_reduction <add>, %37, %cst_12 [1, 2] : vector<1x1x128xf32> to vector<1xf32>
    %39 = vector.shape_cast %38 : vector<1xf32> to vector<1x1x1xf32>
    %40 = vector.extract %39[0, 0, 0] : f32 from vector<1x1x1xf32>
    %41 = vector.broadcast %40 : f32 to vector<1x1xf32>
    %c0_13 = arith.constant 0 : index
    %c0_14 = arith.constant 0 : index
    %42 = vector.load %arg4[%c0_13, %c0_14] : memref<1x1xf32, #tpu.memory_space<vmem>>, vector<1x1xf32>
    %43 = arith.addf %42, %41 : vector<1x1xf32>
    %c0_15 = arith.constant 0 : index
    %c0_16 = arith.constant 0 : index
    %44 = vector.load %arg4[%c0_15, %c0_16] : memref<1x1xf32, #tpu.memory_space<vmem>>, vector<1x1xf32>
    tpu.vector_store %arg4[%c0_15, %c0_16], %43 {strides = array<i32>} : memref<1x1xf32, #tpu.memory_space<vmem>>, vector<1x1xf32>,
    return
  }
  func.func @transform_0(%arg0: i32) -> (i32, i32) {
    %c0_i32 = arith.constant 0 : i32
    %c0_i32_0 = arith.constant 0 : i32
    %c0_i32_1 = arith.constant 0 : i32
    return %c0_i32, %c0_i32_0 : i32, i32
  }
  func.func @transform_1(%arg0: i32) -> (i32, i32) {
    %c0_i32 = arith.constant 0 : i32
    %c0_i32_0 = arith.constant 0 : i32
    return %c0_i32, %arg0 : i32, i32
  }
  func.func @transform_2(%arg0: i32) -> (i32, i32) {
    %c0_i32 = arith.constant 0 : i32
    %c0_i32_0 = arith.constant 0 : i32
    return %c0_i32, %arg0 : i32, i32
  }
  func.func @transform_3(%arg0: i32) -> (i32, i32) {
    %c0_i32 = arith.constant 0 : i32
    %c0_i32_0 = arith.constant 0 : i32
    %c0_i32_1 = arith.constant 0 : i32
    return %c0_i32, %c0_i32_0 : i32, i32
  }
}

</mosaic_0001>

<bundles_post_ra>
// kernel: tpu_custom_call.1
= control target key start
LH: loop header
LB: loop body
LE: loop exit
PB: predicated region body
PF: predicated region fallthrough
CT: control target
= control target key end

     0   :  { %v164_v1 = vmov 0   ;;  %s205_s0 = inlined_call_operand.vmem [shape: f32[7,1], index: 0, kind: input, shape index: {}]   ;;  %s206_s1 = inlined_call_operand.vmem [shape: f32[7,128], index: 1, kind: input, shape index: {}]   ;;  %s207_s2 = inlined_call_operand.vmem [shape: s32[1,128], index: 2, kind: input, shape index: {}]   ;;  %s208_s3 = inlined_call_operand.hbm [shape: f32[1,1], index: 3, kind: output, shape index: {}]  }
   0x1   :  { %v70_v0 = vld [vmem:[%s205_s0] sm:$0x7f]  ;;  %130 = vset.pattern.permute.xlu0 %v164_v1 }
   0x2   :  { %8 = vsyncpa [#allocation3], 0  ;;  %73 = vperm.xlu0 %130, %v70_v0   ;;  %v21_v2 = vld [vmem:[%s206_s1] sm:$0x7f]  ;;  %vm22_vm0 = vcmask 1046528   ;;  %v55_v27 = vlaneseq  ;;  %vm19_vm5 = vcmask 0  }
   0x3   :  { %v23_v3 = vsel %vm22_vm0, %v21_v2, -inf  ;;  %v131_v31 = vld [vmem:[%s207_s2] ss:$0 sm:$0xff]  ;;  %v165_v33 = vmov 0.0   ;;  %vm92_vm7 = vcmask 1040384   ;;  %s166_s2 = smov [#allocation2]  }
   0x4   :  { %v24_v4 = vrot.slane %v23_v3, 4  ;;  %v56_v30 = vshrl.u32 %v55_v27, 7  ;;  %20 = vst.msk [vmem:[#allocation2] sm:$0x1] %vm19_vm5, %v165_v33  ;;  %s113_s16 = sshll.u32 %s166_s2, 4  ;;  %s115_s19 = sshll.u32 %s208_s3, 4  ;;  %s114_s16 = int_to_ptr.vmem [resolvable:$true] %s113_s16  ;;  %s116_s19 = int_to_ptr.hbm [resolvable:$true] %s115_s19 }
   0x6   :  { %v25_v5 = vmax.f32 %v23_v3, %v24_v4  ;;  %vm59_vm6 = vcmp.eq.s32.totalorder %v56_v30, %v131_v31 }
   0x7   :  { %v124_v35 = vsel %vm59_vm6, 1.0, %v165_v33 }
   0x8   :  { %v26_v6 = vrot.slane %v25_v5, 2 }
   0xa   :  { %v27_v7 = vmax.f32 %v25_v5, %v26_v6 }
   0xb   :  { %v104_v5 = vld [vmem:[#allocation2] sm:$0x1] }
   0xc   :  { %v28_v8 = vrot.slane %v27_v7, 1 }
   0xe   :  { %v29_v9 = vmax.f32 %v27_v7, %v28_v8 }
  0x10   :  { %v30_v10 = vsub.f32 %v21_v2, %v29_v9 }
  0x12   :  { %v31_v11 = vmul.f32 1.442695, %v30_v10 }
  0x14   :  { %132 = vpow2.f32 %v31_v11 }
  0x1a   :  { %v133_v12 = vpop.eup %132 }
  0x1b   :  { %v33_v13 = vsel %vm22_vm0, %v133_v12, 0.0 }
  0x1c   :  { %v34_v14 = vrot.slane %v33_v13, 4 }
  0x1e   :  { %v35_v15 = vadd.f32 %v34_v14, %v33_v13 }
  0x20   :  { %v36_v16 = vrot.slane %v35_v15, 2 }
  0x22   :  { %v37_v17 = vadd.f32 %v36_v16, %v35_v15 }
  0x24   :  { %v38_v18 = vrot.slane %v37_v17, 1 }
  0x26   :  { %v39_v19 = vadd.f32 %v38_v18, %v37_v17 }
  0x28   :  { %134 = vrcp.f32 %v39_v19  ;;  %vm45_vm1 = vweird.f32 %v39_v19  ;;  %v51_v24 = vand.u32 2147483648, %v39_v19  ;;  %v49_v26 = vand.u32 2147483647, %v39_v19 }
  0x2a   :  { %v52_v28 = vor.u32 1.1754944e-38, %v51_v24  ;;  %vm50_vm4 = vcmp.eq.f32.partialorder %v49_v26, 8.507059e+37 }
  0x2e   :  { %v135_v20 = vpop.eup %134 }
  0x2f   :  { %v41_v21 = vmul.f32 %v135_v20, %v39_v19  ;;  %vm46_vm2 = vweird.f32 %v135_v20 }
  0x30   :  { %vm47_vm3 = vmor %vm45_vm1, %vm46_vm2 }
  0x31   :  { %v42_v22 = vsub.f32 1.0, %v41_v21 }
  0x33   :  { %v43_v23 = vmul.f32 %v135_v20, %v42_v22 }
  0x35   :  { %v44_v25 = vadd.f32 %v135_v20, %v43_v23 }
  0x37   :  { %v48_v29 = vsel %vm47_vm3, %v135_v20, %v44_v25 }
  0x38   :  { %v53_v32 = vsel %vm50_vm4, %v52_v28, %v48_v29 }
  0x39   :  { %v54_v34 = vmul.f32 %v133_v12, %v53_v32 }
  0x3b   :  { %v62_v36 = vmul.f32 %v124_v35, %v54_v34 }
  0x3d   :  { %v63_v37 = vsel %vm22_vm0, %v62_v36, 0.0 }
  0x3e   :  { %v64_v38 = vrot.slane %v63_v37, 4 }
  0x40   :  { %v65_v39 = vadd.f32 %v64_v38, %v63_v37 }
  0x42   :  { %v66_v40 = vrot.slane %v65_v39, 2 }
  0x44   :  { %v67_v41 = vadd.f32 %v66_v40, %v65_v39 }
  0x46   :  { %v68_v42 = vrot.slane %v67_v41, 1 }
  0x48   :  { %v69_v45 = vadd.f32 %v68_v42, %v67_v41 }
  0x4a   :  { %v84_v48 = vmax.f32 %v69_v45, 0.0001 }
  0x4c   :  { %136 = vlog2.f32 %v84_v48  ;;  %v85_v54 = vsub.f32 1.0, %v84_v48 }
  0x52   :  { %v137_v55 = vpop.eup %136 }
  0x53   :  { %v90_v58 = vmul.f32 0.6931472, %v137_v55 }
  0x74   :  { %v74_v43 = vpop.permute.xlu0 %73 }
  0x75   :  { %v76_v44 = vmul.f32 %v124_v35, %v74_v43 }
  0x77   :  { %v77_v46 = vsel %vm22_vm0, %v76_v44, 0.0 }
  0x78   :  { %v78_v47 = vrot.slane %v77_v46, 4 }
  0x7a   :  { %v79_v49 = vadd.f32 %v78_v47, %v77_v46 }
  0x7c   :  { %v80_v50 = vrot.slane %v79_v49, 2 }
  0x7e   :  { %v81_v51 = vadd.f32 %v80_v50, %v79_v49 }
  0x80   :  { %v82_v52 = vrot.slane %v81_v51, 1 }
  0x82   :  { %v83_v53 = vadd.f32 %v82_v52, %v81_v51 }
  0x84   :  { %v86_v56 = vsub.f32 0.0, %v83_v53 }
  0x86   :  { %v87_v57 = vmul.f32 %v86_v56, %v85_v54 }
  0x88   :  { %v88_v59 = vmul.f32 %v87_v57, %v85_v54 }
  0x8a   :  { %v91_v60 = vmul.f32 %v90_v58, %v88_v59 }
  0x8c   :  { %v93_v61 = vsel %vm92_vm7, %v91_v60, 0.0 }
  0x8d   :  { %94 = vadd.xlane.f32.xlu0 %v93_v61 }
 0x100   :  { %v95_v62 = vpop.xlane.xlu0 %94 }
 0x101   :  { %v96_v63 = vrot.slane %v95_v62, 4 }
 0x103   :  { %v97_v0 = vadd.f32 %v96_v63, %v95_v62 }
 0x105   :  { %v98_v1 = vrot.slane %v97_v0, 2 }
 0x107   :  { %v99_v2 = vadd.f32 %v98_v1, %v97_v0 }
 0x109   :  { %v100_v3 = vrot.slane %v99_v2, 1 }
 0x10b   :  { %v101_v4 = vadd.f32 %v100_v3, %v99_v2 }
 0x10d   :  { %125 = vpush %v101_v4 }
 0x13e   :  { %s126_s20 = spop %125 }
 0x13f   :  { %v103_v6 = vstv %s126_s20 }
 0x140   :  { %v105_v7 = vadd.f32 %v104_v5, %v103_v6 }
 0x142   :  { %107 = vst.msk [vmem:[#allocation2] sm:$0x1] %vm19_vm5, %v105_v7 }
 0x143   :  { %118 = dma.vmem_to_hbm [thread:$0]  %s114_s16, 16, %s116_s19, [#allocation3]  }
 0x144   :  { %162 = dma.done.wait [#allocation3], 16  }
 0x145   :  { %163 = vsyncadd [#allocation3], 4294967280 }
 0x146   :  { %123 = vsyncpa [#allocation3], 1 }

</bundles_post_ra>
